<compile_context>
chip_gen: v6e
topology: v6e:2x2x1
jax: 0.10.0
libtpu: 0.0.40
codegen_flags: <defaults>
</compile_context>

<pallas_src>
import functools

import jax
import jax.numpy as jnp
from jax.experimental import pallas as pl
from jax.experimental.pallas import tpu as pltpu

LANES = 128
MAX_BLOCK_ROWS = 512   # 512 sublane-rows x 128 lanes = 65536 boxes per grid step.
                       # Per-step VMEM (weighted): 9ch * 512*128*4B * 2 buffers
                       # + 3ch scratch  ~ 5.5 MiB -> safe on v5e/v6e/v7x.


def _compute_losses(x_ref, loc_loss_type):
    # x_ref: (C, block_rows, 128) f32, channel-major; channels 0..3 = pred
    # (l,t,r,b), 4..7 = target (l,t,r,b), [8 = weight].  Box index is packed
    # densely on (sublane, lane) so every VALU op works on full 1024-elem vregs.
    p_l, p_t, p_r, p_b = x_ref[0], x_ref[1], x_ref[2], x_ref[3]
    t_l, t_t, t_r, t_b = x_ref[4], x_ref[5], x_ref[6], x_ref[7]

    pred_area = (p_l + p_r) * (p_t + p_b)
    target_area = (t_l + t_r) * (t_t + t_b)

    w_intersect = jnp.minimum(p_l, t_l) + jnp.minimum(p_r, t_r)
    g_w_intersect = jnp.maximum(p_l, t_l) + jnp.maximum(p_r, t_r)
    h_intersect = jnp.minimum(p_b, t_b) + jnp.minimum(p_t, t_t)
    g_h_intersect = jnp.maximum(p_b, t_b) + jnp.maximum(p_t, t_t)

    ac_union = g_w_intersect * g_h_intersect + 1e-7
    area_intersect = w_intersect * h_intersect
    area_union = target_area + pred_area - area_intersect

    ious = (area_intersect + 1.0) / (area_union + 1.0)
    gious = ious - (ac_union - area_union) / ac_union

    if loc_loss_type == 'iou':
        return -jnp.log(ious)          # EUP slot; effectively free next to VALU work
    elif loc_loss_type == 'linear_iou':
        return 1.0 - ious
    elif loc_loss_type == 'giou':
        return 1.0 - gious
    else:
        raise NotImplementedError(loc_loss_type)


def _giou_kernel(x_ref, out_ref, acc_ref, *, n, block_rows, steps_per_core,
                 has_weight, loc_loss_type):
    # acc_ref: (3 or 1, block_rows, 128) f32 full-vreg accumulator scratch:
    #   ch 0 = partials of sum(loss * w)   (or sum(loss) when unweighted)
    #   ch 1 = partials of sum(w)
    #   ch 2 = partials of sum(loss)
    g = pl.program_id(1)
    step = pl.program_id(0) * steps_per_core + g
    block_elems = block_rows * LANES

    @pl.when(g == 0)
    def _():
        acc_ref[...] = jnp.zeros_like(acc_ref)

    losses = _compute_losses(x_ref, loc_loss_type)
    if has_weight:
        w = x_ref[8]                   # zero-padded by the wrapper

    def accumulate(lv):
        if has_weight:
            acc_ref[0] = acc_ref[0] + lv * w
            acc_ref[1] = acc_ref[1] + w
            acc_ref[2] = acc_ref[2] + lv
        else:
            acc_ref[0] = acc_ref[0] + lv

    block_start = step * block_elems
    # Tail mask only on blocks whose index range crosses n.  Padded zero boxes
    # evaluate to loss=1.0 in the 'giou' branch, so the mask is load-bearing
    # there — but at most one block per core actually contains the tail.
    @pl.when(block_start + block_elems > n)
    def _():
        row = jax.lax.broadcasted_iota(jnp.int32, (block_rows, LANES), 0)
        lane = jax.lax.broadcasted_iota(jnp.int32, (block_rows, LANES), 1)
        idx = block_start + row * LANES + lane
        accumulate(jnp.where(idx < n, losses, 0.0))

    @pl.when(block_start + block_elems <= n)
    def _():
        accumulate(losses)

    # Epilogue: one sublane (XLU) reduction per accumulator channel, once per
    # core, instead of 3 reduces + 3 masked (1,128) stores on every step.
    @pl.when(g == pl.num_programs(1) - 1)
    def _():
        out_ref[...] = jnp.zeros_like(out_ref)
        for ch in range(acc_ref.shape[0]):
            out_ref[pl.ds(ch, 1), :] = jnp.sum(acc_ref[ch], axis=0, keepdims=True)


def _round_up(x, m):
    return ((x + m - 1) // m) * m


def _cdiv(a, b):
    return -(-a // b)


def _num_tensorcores():
    # v7x has 2 TensorCores per chip; v5e / v6e have 1.  Splitting on a
    # single-TC part is just a serial loop plus extra padding, so gate it.
    try:
        kind = jax.devices()[0].device_kind.lower()
    except Exception:
        return 1
    if 'v7' in kind or 'tpu7' in kind:
        return 2
    return 1


@functools.partial(jax.jit, static_argnames=('loc_loss_type',))
def giou_loss(pred, target, weight=None, loc_loss_type='giou'):
    """pred, target: (N, 4) f32; weight: (N,) f32 or None. Returns scalar f32."""
    n = pred.shape[0]
    assert n > 0
    has_weight = weight is not None

    # Tight, generation-aware tiling of the box axis.
    rows_needed = _cdiv(n, LANES)
    num_cores = _num_tensorcores() if rows_needed >= 16 else 1
    rows_per_core = _cdiv(rows_needed, num_cores)
    steps_per_core = max(1, _cdiv(rows_per_core, MAX_BLOCK_ROWS))
    block_rows = _round_up(_cdiv(rows_per_core, steps_per_core), 8)
    rows_pad = block_rows * steps_per_core * num_cores
    n_pad = rows_pad * LANES

    # Single stacked channel-major input (C, rows_pad, 128); one staging op.
    chans = [jnp.transpose(pred.astype(jnp.float32)),
             jnp.transpose(target.astype(jnp.float32))]
    if has_weight:
        chans.append(weight.astype(jnp.float32).reshape(1, n))
    num_ch = 9 if has_weight else 8
    x = jnp.concatenate(chans, axis=0)
    x = jnp.pad(x, ((0, 0), (0, n_pad - n))).reshape(num_ch, rows_pad, LANES)
    # TODO(synk): bf16 staging of the 8 box channels would cut ~44% of HBM
    # traffic but changes precision vs the f32 torch reference; left at f32.

    in_spec = pl.BlockSpec((num_ch, block_rows, LANES),
                           lambda c, g: (0, c * steps_per_core + g, 0))
    out_spec = pl.BlockSpec((None, 8, LANES), lambda c, g: (c, 0, 0))
    out_shape = jax.ShapeDtypeStruct((num_cores, 8, LANES), jnp.float32)
    n_acc = 3 if has_weight else 1

    # TODO(synk): if an xprof trace on v7x shows the leading "parallel" axis is
    # not sharded across both TensorCores, switch it to pltpu.CORE_PARALLEL.
    compiler_params = pltpu.CompilerParams(
        dimension_semantics=("parallel", "arbitrary"),
        vmem_limit_bytes=32 * 1024 * 1024,
        allow_input_fusion=[True])

    partials = pl.pallas_call(
        functools.partial(_giou_kernel, n=n, block_rows=block_rows,
                          steps_per_core=steps_per_core, has_weight=has_weight,
                          loc_loss_type=loc_loss_type),
        out_shape=out_shape,
        grid_spec=pltpu.PrefetchScalarGridSpec(
            num_scalar_prefetch=0,
            grid=(num_cores, steps_per_core),
            in_specs=[in_spec],
            out_specs=out_spec,
            scratch_shapes=[pltpu.VMEM((n_acc, block_rows, LANES), jnp.float32)]),
        compiler_params=compiler_params,
    )(x)

    if not has_weight:
        return jnp.sum(partials[:, 0, :]) / n

    weighted_sum = jnp.sum(partials[:, 0, :])
    weight_sum = jnp.sum(partials[:, 1, :])
    loss_sum = jnp.sum(partials[:, 2, :])
    # torch: weighted mean iff weight.sum() > 0, else plain mean.  Guard the
    # denominator so the dead branch never produces 0/0 (autodiff-safe).
    return jnp.where(weight_sum > 0,
                     weighted_sum / jnp.maximum(weight_sum, 1e-30),
                     loss_sum / n)


def _giou_loss_ref(pred, target, weight=None, loc_loss_type='giou'):
    """Plain-JAX reference, mirrors the PyTorch forward."""
    p_l, p_t, p_r, p_b = pred[:, 0], pred[:, 1], pred[:, 2], pred[:, 3]
    t_l, t_t, t_r, t_b = target[:, 0], target[:, 1], target[:, 2], target[:, 3]
    pred_area = (p_l + p_r) * (p_t + p_b)
    target_area = (t_l + t_r) * (t_t + t_b)
    w_int = jnp.minimum(p_l, t_l) + jnp.minimum(p_r, t_r)
    g_w_int = jnp.maximum(p_l, t_l) + jnp.maximum(p_r, t_r)
    h_int = jnp.minimum(p_b, t_b) + jnp.minimum(p_t, t_t)
    g_h_int = jnp.maximum(p_b, t_b) + jnp.maximum(p_t, t_t)
    ac = g_w_int * g_h_int + 1e-7
    a_int = w_int * h_int
    a_uni = target_area + pred_area - a_int
    ious = (a_int + 1.0) / (a_uni + 1.0)
    gious = ious - (ac - a_uni) / ac
    if loc_loss_type == 'iou':
        losses = -jnp.log(ious)
    elif loc_loss_type == 'linear_iou':
        losses = 1.0 - ious
    else:
        losses = 1.0 - gious
    if weight is not None and jnp.sum(weight) > 0:
        return jnp.sum(losses * weight) / jnp.sum(weight)
    return jnp.mean(losses)


if __name__ == "__main__":
    key = jax.random.PRNGKey(0)
    k1, k2, k3, k4, k5, k6 = jax.random.split(key, 6)

    # Small shape typical of pysot box regression: N boxes x (l, t, r, b).
    N = 200  # intentionally not a multiple of 128
    pred = jnp.abs(jax.random.normal(k1, (N, 4), dtype=jnp.float32)) + 0.1
    target = jnp.abs(jax.random.normal(k2, (N, 4), dtype=jnp.float32)) + 0.1
    weight = jnp.abs(jax.random.normal(k3, (N,), dtype=jnp.float32))

    out_w = jax.block_until_ready(giou_loss(pred, target, weight))
    out_nw = jax.block_until_ready(giou_loss(pred, target, None))
    out_lin = jax.block_until_ready(
        giou_loss(pred, target, weight, loc_loss_type='linear_iou'))
    out_iou = jax.block_until_ready(
        giou_loss(pred, target, weight, loc_loss_type='iou'))

    assert jnp.allclose(out_w, _giou_loss_ref(pred, target, weight, 'giou'),
                        rtol=1e-5, atol=1e-5), out_w
    assert jnp.allclose(out_nw, _giou_loss_ref(pred, target, None, 'giou'),
                        rtol=1e-5, atol=1e-5), out_nw
    assert jnp.allclose(out_lin, _giou_loss_ref(pred, target, weight, 'linear_iou'),
                        rtol=1e-5, atol=1e-5), out_lin
    assert jnp.allclose(out_iou, _giou_loss_ref(pred, target, weight, 'iou'),
                        rtol=1e-5, atol=1e-5), out_iou

    # Larger case exercising the multi-step tiled grid (steps_per_core >= 2 on
    # single-TC chips) and the 2-core split on v7x.
    N2 = 70000
    pred2 = jnp.abs(jax.random.normal(k4, (N2, 4), dtype=jnp.float32)) + 0.1
    target2 = jnp.abs(jax.random.normal(k5, (N2, 4), dtype=jnp.float32)) + 0.1
    weight2 = jnp.abs(jax.random.normal(k6, (N2,), dtype=jnp.float32))
    out2 = jax.block_until_ready(giou_loss(pred2, target2, weight2))
    assert jnp.allclose(out2, _giou_loss_ref(pred2, target2, weight2, 'giou'),
                        rtol=1e-4, atol=1e-4), out2
    out2_nw = jax.block_until_ready(giou_loss(pred2, target2, None))
    assert jnp.allclose(out2_nw, _giou_loss_ref(pred2, target2, None, 'giou'),
                        rtol=1e-4, atol=1e-4), out2_nw

    print("KERNEL_OK")
</pallas_src>

<mosaic_0001>
module attributes {stable_mosaic.version = 11 : i64} {
  func.func @_giou_kernel(%arg0: i32, %arg1: i32, %arg2: memref<9x8x128xf32, #tpu.memory_space<vmem>>, %arg3: memref<1x8x128xf32, #tpu.memory_space<vmem>>, %arg4: memref<3x8x128xf32, #tpu.memory_space<vmem>>) attributes {dimension_semantics = [#tpu.dimension_semantics<parallel>, #tpu.dimension_semantics<arbitrary>], iteration_bounds = array<i64: 1, 1>, scalar_prefetch = 0 : i64, scratch_operands = 1 : i64, tpu.core_type = #tpu.core_type<tc>, window_params = [{transform_indices = @transform_0, window_bounds = array<i64: 9, 8, 128>}, {transform_indices = @transform_1, window_bounds = array<i64: 1, 8, 128>}]} {
    %c1_i32 = arith.constant 1 : i32
    %0 = arith.muli %arg0, %c1_i32 : i32
    %1 = arith.addi %0, %arg1 : i32
    %c0_i32 = arith.constant 0 : i32
    %2 = arith.cmpi eq, %arg1, %c0_i32 : i32
    %3 = arith.extui %2 : i1 to i32
    %c0_i32_0 = arith.constant 0 : i32
    %4 = arith.cmpi ne, %3, %c0_i32_0 : i32
    scf.if %4 {
      %cst_29 = arith.constant 0.000000e+00 : f32
      %69 = vector.broadcast %cst_29 : f32 to vector<3x8x128xf32>
      %c0_30 = arith.constant 0 : index
      %c0_31 = arith.constant 0 : index
      %c0_32 = arith.constant 0 : index
      %70 = vector.load %arg4[%c0_30, %c0_31, %c0_32] : memref<3x8x128xf32, #tpu.memory_space<vmem>>, vector<3x8x128xf32>
      tpu.vector_store %arg4[%c0_30, %c0_31, %c0_32], %69 {strides = array<i32>} : memref<3x8x128xf32, #tpu.memory_space<vmem>>, vector<3x8x128xf32>,
    } else {
    }
    %c0 = arith.constant 0 : index
    %c0_1 = arith.constant 0 : index
    %c0_2 = arith.constant 0 : index
    %5 = vector.load %arg2[%c0, %c0_1, %c0_2] : memref<9x8x128xf32, #tpu.memory_space<vmem>>, vector<1x8x128xf32>
    %6 = vector.shape_cast %5 : vector<1x8x128xf32> to vector<8x128xf32>
    %c1 = arith.constant 1 : index
    %c0_3 = arith.constant 0 : index
    %c0_4 = arith.constant 0 : index
    %7 = vector.load %arg2[%c1, %c0_3, %c0_4] : memref<9x8x128xf32, #tpu.memory_space<vmem>>, vector<1x8x128xf32>
    %8 = vector.shape_cast %7 : vector<1x8x128xf32> to vector<8x128xf32>
    %c2 = arith.constant 2 : index
    %c0_5 = arith.constant 0 : index
    %c0_6 = arith.constant 0 : index
    %9 = vector.load %arg2[%c2, %c0_5, %c0_6] : memref<9x8x128xf32, #tpu.memory_space<vmem>>, vector<1x8x128xf32>
    %10 = vector.shape_cast %9 : vector<1x8x128xf32> to vector<8x128xf32>
    %c3 = arith.constant 3 : index
    %c0_7 = arith.constant 0 : index
    %c0_8 = arith.constant 0 : index
    %11 = vector.load %arg2[%c3, %c0_7, %c0_8] : memref<9x8x128xf32, #tpu.memory_space<vmem>>, vector<1x8x128xf32>
    %12 = vector.shape_cast %11 : vector<1x8x128xf32> to vector<8x128xf32>
    %c4 = arith.constant 4 : index
    %c0_9 = arith.constant 0 : index
    %c0_10 = arith.constant 0 : index
    %13 = vector.load %arg2[%c4, %c0_9, %c0_10] : memref<9x8x128xf32, #tpu.memory_space<vmem>>, vector<1x8x128xf32>
    %14 = vector.shape_cast %13 : vector<1x8x128xf32> to vector<8x128xf32>
    %c5 = arith.constant 5 : index
    %c0_11 = arith.constant 0 : index
    %c0_12 = arith.constant 0 : index
    %15 = vector.load %arg2[%c5, %c0_11, %c0_12] : memref<9x8x128xf32, #tpu.memory_space<vmem>>, vector<1x8x128xf32>
    %16 = vector.shape_cast %15 : vector<1x8x128xf32> to vector<8x128xf32>
    %c6 = arith.constant 6 : index
    %c0_13 = arith.constant 0 : index
    %c0_14 = arith.constant 0 : index
    %17 = vector.load %arg2[%c6, %c0_13, %c0_14] : memref<9x8x128xf32, #tpu.memory_space<vmem>>, vector<1x8x128xf32>
    %18 = vector.shape_cast %17 : vector<1x8x128xf32> to vector<8x128xf32>
    %c7 = arith.constant 7 : index
    %c0_15 = arith.constant 0 : index
    %c0_16 = arith.constant 0 : index
    %19 = vector.load %arg2[%c7, %c0_15, %c0_16] : memref<9x8x128xf32, #tpu.memory_space<vmem>>, vector<1x8x128xf32>
    %20 = vector.shape_cast %19 : vector<1x8x128xf32> to vector<8x128xf32>
    %21 = arith.addf %6, %10 : vector<8x128xf32>
    %22 = arith.addf %8, %12 : vector<8x128xf32>
    %23 = arith.mulf %21, %22 : vector<8x128xf32>
    %24 = arith.addf %14, %18 : vector<8x128xf32>
    %25 = arith.addf %16, %20 : vector<8x128xf32>
    %26 = arith.mulf %24, %25 : vector<8x128xf32>
    %27 = arith.minimumf %6, %14 : vector<8x128xf32>
    %28 = arith.minimumf %10, %18 : vector<8x128xf32>
    %29 = arith.addf %27, %28 : vector<8x128xf32>
    %30 = arith.maximumf %6, %14 : vector<8x128xf32>
    %31 = arith.maximumf %10, %18 : vector<8x128xf32>
    %32 = arith.addf %30, %31 : vector<8x128xf32>
    %33 = arith.minimumf %12, %20 : vector<8x128xf32>
    %34 = arith.minimumf %8, %16 : vector<8x128xf32>
    %35 = arith.addf %33, %34 : vector<8x128xf32>
    %36 = arith.maximumf %12, %20 : vector<8x128xf32>
    %37 = arith.maximumf %8, %16 : vector<8x128xf32>
    %38 = arith.addf %36, %37 : vector<8x128xf32>
    %39 = arith.mulf %32, %38 : vector<8x128xf32>
    %cst = arith.constant 1.000000e-07 : f32
    %40 = vector.broadcast %cst : f32 to vector<8x128xf32>
    %41 = arith.addf %39, %40 : vector<8x128xf32>
    %42 = arith.mulf %29, %35 : vector<8x128xf32>
    %43 = arith.addf %26, %23 : vector<8x128xf32>
    %44 = arith.subf %43, %42 : vector<8x128xf32>
    %cst_17 = arith.constant 1.000000e+00 : f32
    %45 = vector.broadcast %cst_17 : f32 to vector<8x128xf32>
    %46 = arith.addf %42, %45 : vector<8x128xf32>
    %cst_18 = arith.constant 1.000000e+00 : f32
    %47 = vector.broadcast %cst_18 : f32 to vector<8x128xf32>
    %48 = arith.addf %44, %47 : vector<8x128xf32>
    %49 = arith.divf %46, %48 : vector<8x128xf32>
    %50 = arith.subf %41, %44 : vector<8x128xf32>
    %51 = arith.divf %50, %41 : vector<8x128xf32>
    %52 = arith.subf %49, %51 : vector<8x128xf32>
    %cst_19 = arith.constant 1.000000e+00 : f32
    %53 = vector.broadcast %cst_19 : f32 to vector<8x128xf32>
    %54 = arith.subf %53, %52 : vector<8x128xf32>
    %c8 = arith.constant 8 : index
    %c0_20 = arith.constant 0 : index
    %c0_21 = arith.constant 0 : index
    %55 = vector.load %arg2[%c8, %c0_20, %c0_21] : memref<9x8x128xf32, #tpu.memory_space<vmem>>, vector<1x8x128xf32>
    %56 = vector.shape_cast %55 : vector<1x8x128xf32> to vector<8x128xf32>
    %c1024_i32 = arith.constant 1024 : i32
    %57 = arith.muli %1, %c1024_i32 : i32
    %c1024_i32_22 = arith.constant 1024 : i32
    %58 = arith.addi %57, %c1024_i32_22 : i32
    %c200_i32 = arith.constant 200 : i32
    %59 = arith.cmpi sgt, %58, %c200_i32 : i32
    %60 = arith.extui %59 : i1 to i32
    %c0_i32_23 = arith.constant 0 : i32
    %61 = arith.cmpi ne, %60, %c0_i32_23 : i32
    scf.if %61 {
      %69 = tpu.iota {dimensions = array<i32: 0>} : vector<8x128xi32>
      %70 = tpu.iota {dimensions = array<i32: 1>} : vector<8x128xi32>
      %c128_i32 = arith.constant 128 : i32
      %71 = vector.broadcast %c128_i32 : i32 to vector<8x128xi32>
      %72 = arith.muli %69, %71 : vector<8x128xi32>
      %73 = vector.broadcast %57 : i32 to vector<8x128xi32>
      %74 = arith.addi %73, %72 : vector<8x128xi32>
      %75 = arith.addi %74, %70 : vector<8x128xi32>
      %c200_i32_29 = arith.constant 200 : i32
      %76 = vector.broadcast %c200_i32_29 : i32 to vector<8x128xi32>
      %77 = arith.cmpi slt, %75, %76 : vector<8x128xi32>
      %cst_30 = arith.constant 0.000000e+00 : f32
      %78 = vector.broadcast %cst_30 : f32 to vector<8x128xf32>
      %79 = arith.select %77, %54, %78 : vector<8x128xi1>, vector<8x128xf32>
      %c0_31 = arith.constant 0 : index
      %c0_32 = arith.constant 0 : index
      %c0_33 = arith.constant 0 : index
      %80 = vector.load %arg4[%c0_31, %c0_32, %c0_33] : memref<3x8x128xf32, #tpu.memory_space<vmem>>, vector<1x8x128xf32>
      %81 = vector.shape_cast %80 : vector<1x8x128xf32> to vector<8x128xf32>
      %82 = arith.mulf %79, %56 : vector<8x128xf32>
      %83 = arith.addf %81, %82 : vector<8x128xf32>
      %c0_34 = arith.constant 0 : index
      %c0_35 = arith.constant 0 : index
      %c0_36 = arith.constant 0 : index
      %84 = vector.load %arg4[%c0_34, %c0_35, %c0_36] : memref<3x8x128xf32, #tpu.memory_space<vmem>>, vector<1x8x128xf32>
      %85 = vector.shape_cast %84 : vector<1x8x128xf32> to vector<8x128xf32>
      %86 = vector.shape_cast %83 : vector<8x128xf32> to vector<1x8x128xf32>
      tpu.vector_store %arg4[%c0_34, %c0_35, %c0_36], %86 {strides = array<i32>} : memref<3x8x128xf32, #tpu.memory_space<vmem>>, vector<1x8x128xf32>,
      %c1_37 = arith.constant 1 : index
      %c0_38 = arith.constant 0 : index
      %c0_39 = arith.constant 0 : index
      %87 = vector.load %arg4[%c1_37, %c0_38, %c0_39] : memref<3x8x128xf32, #tpu.memory_space<vmem>>, vector<1x8x128xf32>
      %88 = vector.shape_cast %87 : vector<1x8x128xf32> to vector<8x128xf32>
      %89 = arith.addf %88, %56 : vector<8x128xf32>
      %c1_40 = arith.constant 1 : index
      %c0_41 = arith.constant 0 : index
      %c0_42 = arith.constant 0 : index
      %90 = vector.load %arg4[%c1_40, %c0_41, %c0_42] : memref<3x8x128xf32, #tpu.memory_space<vmem>>, vector<1x8x128xf32>
      %91 = vector.shape_cast %90 : vector<1x8x128xf32> to vector<8x128xf32>
      %92 = vector.shape_cast %89 : vector<8x128xf32> to vector<1x8x128xf32>
      tpu.vector_store %arg4[%c1_40, %c0_41, %c0_42], %92 {strides = array<i32>} : memref<3x8x128xf32, #tpu.memory_space<vmem>>, vector<1x8x128xf32>,
      %c2_43 = arith.constant 2 : index
      %c0_44 = arith.constant 0 : index
      %c0_45 = arith.constant 0 : index
      %93 = vector.load %arg4[%c2_43, %c0_44, %c0_45] : memref<3x8x128xf32, #tpu.memory_space<vmem>>, vector<1x8x128xf32>
      %94 = vector.shape_cast %93 : vector<1x8x128xf32> to vector<8x128xf32>
      %95 = arith.addf %94, %79 : vector<8x128xf32>
      %c2_46 = arith.constant 2 : index
      %c0_47 = arith.constant 0 : index
      %c0_48 = arith.constant 0 : index
      %96 = vector.load %arg4[%c2_46, %c0_47, %c0_48] : memref<3x8x128xf32, #tpu.memory_space<vmem>>, vector<1x8x128xf32>
      %97 = vector.shape_cast %96 : vector<1x8x128xf32> to vector<8x128xf32>
      %98 = vector.shape_cast %95 : vector<8x128xf32> to vector<1x8x128xf32>
      tpu.vector_store %arg4[%c2_46, %c0_47, %c0_48], %98 {strides = array<i32>} : memref<3x8x128xf32, #tpu.memory_space<vmem>>, vector<1x8x128xf32>,
    } else {
    }
    %c1024_i32_24 = arith.constant 1024 : i32
    %62 = arith.addi %57, %c1024_i32_24 : i32
    %c200_i32_25 = arith.constant 200 : i32
    %63 = arith.cmpi sle, %62, %c200_i32_25 : i32
    %64 = arith.extui %63 : i1 to i32
    %c0_i32_26 = arith.constant 0 : i32
    %65 = arith.cmpi ne, %64, %c0_i32_26 : i32
    scf.if %65 {
      %c0_29 = arith.constant 0 : index
      %c0_30 = arith.constant 0 : index
      %c0_31 = arith.constant 0 : index
      %69 = vector.load %arg4[%c0_29, %c0_30, %c0_31] : memref<3x8x128xf32, #tpu.memory_space<vmem>>, vector<1x8x128xf32>
      %70 = vector.shape_cast %69 : vector<1x8x128xf32> to vector<8x128xf32>
      %71 = arith.mulf %54, %56 : vector<8x128xf32>
      %72 = arith.addf %70, %71 : vector<8x128xf32>
      %c0_32 = arith.constant 0 : index
      %c0_33 = arith.constant 0 : index
      %c0_34 = arith.constant 0 : index
      %73 = vector.load %arg4[%c0_32, %c0_33, %c0_34] : memref<3x8x128xf32, #tpu.memory_space<vmem>>, vector<1x8x128xf32>
      %74 = vector.shape_cast %73 : vector<1x8x128xf32> to vector<8x128xf32>
      %75 = vector.shape_cast %72 : vector<8x128xf32> to vector<1x8x128xf32>
      tpu.vector_store %arg4[%c0_32, %c0_33, %c0_34], %75 {strides = array<i32>} : memref<3x8x128xf32, #tpu.memory_space<vmem>>, vector<1x8x128xf32>,
      %c1_35 = arith.constant 1 : index
      %c0_36 = arith.constant 0 : index
      %c0_37 = arith.constant 0 : index
      %76 = vector.load %arg4[%c1_35, %c0_36, %c0_37] : memref<3x8x128xf32, #tpu.memory_space<vmem>>, vector<1x8x128xf32>
      %77 = vector.shape_cast %76 : vector<1x8x128xf32> to vector<8x128xf32>
      %78 = arith.addf %77, %56 : vector<8x128xf32>
      %c1_38 = arith.constant 1 : index
      %c0_39 = arith.constant 0 : index
      %c0_40 = arith.constant 0 : index
      %79 = vector.load %arg4[%c1_38, %c0_39, %c0_40] : memref<3x8x128xf32, #tpu.memory_space<vmem>>, vector<1x8x128xf32>
      %80 = vector.shape_cast %79 : vector<1x8x128xf32> to vector<8x128xf32>
      %81 = vector.shape_cast %78 : vector<8x128xf32> to vector<1x8x128xf32>
      tpu.vector_store %arg4[%c1_38, %c0_39, %c0_40], %81 {strides = array<i32>} : memref<3x8x128xf32, #tpu.memory_space<vmem>>, vector<1x8x128xf32>,
      %c2_41 = arith.constant 2 : index
      %c0_42 = arith.constant 0 : index
      %c0_43 = arith.constant 0 : index
      %82 = vector.load %arg4[%c2_41, %c0_42, %c0_43] : memref<3x8x128xf32, #tpu.memory_space<vmem>>, vector<1x8x128xf32>
      %83 = vector.shape_cast %82 : vector<1x8x128xf32> to vector<8x128xf32>
      %84 = arith.addf %83, %54 : vector<8x128xf32>
      %c2_44 = arith.constant 2 : index
      %c0_45 = arith.constant 0 : index
      %c0_46 = arith.constant 0 : index
      %85 = vector.load %arg4[%c2_44, %c0_45, %c0_46] : memref<3x8x128xf32, #tpu.memory_space<vmem>>, vector<1x8x128xf32>
      %86 = vector.shape_cast %85 : vector<1x8x128xf32> to vector<8x128xf32>
      %87 = vector.shape_cast %84 : vector<8x128xf32> to vector<1x8x128xf32>
      tpu.vector_store %arg4[%c2_44, %c0_45, %c0_46], %87 {strides = array<i32>} : memref<3x8x128xf32, #tpu.memory_space<vmem>>, vector<1x8x128xf32>,
    } else {
    }
    %c0_i32_27 = arith.constant 0 : i32
    %66 = arith.cmpi eq, %arg1, %c0_i32_27 : i32
    %67 = arith.extui %66 : i1 to i32
    %c0_i32_28 = arith.constant 0 : i32
    %68 = arith.cmpi ne, %67, %c0_i32_28 : i32
    scf.if %68 {
      %cst_29 = arith.constant 0.000000e+00 : f32
      %69 = vector.broadcast %cst_29 : f32 to vector<8x128xf32>
      %c0_30 = arith.constant 0 : index
      %c0_31 = arith.constant 0 : index
      %c0_32 = arith.constant 0 : index
      %70 = vector.load %arg3[%c0_30, %c0_31, %c0_32] : memref<1x8x128xf32, #tpu.memory_space<vmem>>, vector<1x8x128xf32>
      %71 = vector.shape_cast %70 : vector<1x8x128xf32> to vector<8x128xf32>
      %72 = vector.shape_cast %69 : vector<8x128xf32> to vector<1x8x128xf32>
      tpu.vector_store %arg3[%c0_30, %c0_31, %c0_32], %72 {strides = array<i32>} : memref<1x8x128xf32, #tpu.memory_space<vmem>>, vector<1x8x128xf32>,
      %c0_33 = arith.constant 0 : index
      %c0_34 = arith.constant 0 : index
      %c0_35 = arith.constant 0 : index
      %73 = vector.load %arg4[%c0_33, %c0_34, %c0_35] : memref<3x8x128xf32, #tpu.memory_space<vmem>>, vector<1x8x128xf32>
      %74 = vector.shape_cast %73 : vector<1x8x128xf32> to vector<8x128xf32>
      %cst_36 = arith.constant dense<0.000000e+00> : vector<128xf32>
      %75 = vector.multi_reduction <add>, %74, %cst_36 [0] : vector<8x128xf32> to vector<128xf32>
      %76 = vector.shape_cast %75 : vector<128xf32> to vector<1x128xf32>
      %c0_37 = arith.constant 0 : index
      %c0_38 = arith.constant 0 : index
      %c0_39 = arith.constant 0 : index
      %77 = vector.load %arg3[%c0_37, %c0_38, %c0_39] : memref<1x8x128xf32, #tpu.memory_space<vmem>>, vector<1x1x128xf32>
      %78 = vector.shape_cast %77 : vector<1x1x128xf32> to vector<1x128xf32>
      %79 = vector.shape_cast %76 : vector<1x128xf32> to vector<1x1x128xf32>
      tpu.vector_store %arg3[%c0_37, %c0_38, %c0_39], %79 {strides = array<i32>} : memref<1x8x128xf32, #tpu.memory_space<vmem>>, vector<1x1x128xf32>,
      %c1_40 = arith.constant 1 : index
      %c0_41 = arith.constant 0 : index
      %c0_42 = arith.constant 0 : index
      %80 = vector.load %arg4[%c1_40, %c0_41, %c0_42] : memref<3x8x128xf32, #tpu.memory_space<vmem>>, vector<1x8x128xf32>
      %81 = vector.shape_cast %80 : vector<1x8x128xf32> to vector<8x128xf32>
      %cst_43 = arith.constant dense<0.000000e+00> : vector<128xf32>
      %82 = vector.multi_reduction <add>, %81, %cst_43 [0] : vector<8x128xf32> to vector<128xf32>
      %83 = vector.shape_cast %82 : vector<128xf32> to vector<1x128xf32>
      %c0_44 = arith.constant 0 : index
      %c1_45 = arith.constant 1 : index
      %c0_46 = arith.constant 0 : index
      %84 = vector.load %arg3[%c0_44, %c1_45, %c0_46] : memref<1x8x128xf32, #tpu.memory_space<vmem>>, vector<1x1x128xf32>
      %85 = vector.shape_cast %84 : vector<1x1x128xf32> to vector<1x128xf32>
      %86 = vector.shape_cast %83 : vector<1x128xf32> to vector<1x1x128xf32>
      tpu.vector_store %arg3[%c0_44, %c1_45, %c0_46], %86 {strides = array<i32>} : memref<1x8x128xf32, #tpu.memory_space<vmem>>, vector<1x1x128xf32>,
      %c2_47 = arith.constant 2 : index
      %c0_48 = arith.constant 0 : index
      %c0_49 = arith.constant 0 : index
      %87 = vector.load %arg4[%c2_47, %c0_48, %c0_49] : memref<3x8x128xf32, #tpu.memory_space<vmem>>, vector<1x8x128xf32>
      %88 = vector.shape_cast %87 : vector<1x8x128xf32> to vector<8x128xf32>
      %cst_50 = arith.constant dense<0.000000e+00> : vector<128xf32>
      %89 = vector.multi_reduction <add>, %88, %cst_50 [0] : vector<8x128xf32> to vector<128xf32>
      %90 = vector.shape_cast %89 : vector<128xf32> to vector<1x128xf32>
      %c0_51 = arith.constant 0 : index
      %c2_52 = arith.constant 2 : index
      %c0_53 = arith.constant 0 : index
      %91 = vector.load %arg3[%c0_51, %c2_52, %c0_53] : memref<1x8x128xf32, #tpu.memory_space<vmem>>, vector<1x1x128xf32>
      %92 = vector.shape_cast %91 : vector<1x1x128xf32> to vector<1x128xf32>
      %93 = vector.shape_cast %90 : vector<1x128xf32> to vector<1x1x128xf32>
      tpu.vector_store %arg3[%c0_51, %c2_52, %c0_53], %93 {strides = array<i32>} : memref<1x8x128xf32, #tpu.memory_space<vmem>>, vector<1x1x128xf32>,
    } else {
    }
    return
  }
  func.func @transform_0(%arg0: i32, %arg1: i32) -> (i32, i32, i32) {
    %c1_i32 = arith.constant 1 : i32
    %0 = arith.muli %arg0, %c1_i32 : i32
    %1 = arith.addi %0, %arg1 : i32
    %c0_i32 = arith.constant 0 : i32
    %c0_i32_0 = arith.constant 0 : i32
    %c0_i32_1 = arith.constant 0 : i32
    return %c0_i32, %1, %c0_i32_0 : i32, i32, i32
  }
  func.func @transform_1(%arg0: i32, %arg1: i32) -> (i32, i32, i32) {
    %c0_i32 = arith.constant 0 : i32
    %c0_i32_0 = arith.constant 0 : i32
    %c0_i32_1 = arith.constant 0 : i32
    return %arg0, %c0_i32, %c0_i32_0 : i32, i32, i32
  }
}

</mosaic_0001>

<bundles_post_ra>
// kernel: giou_loss.2
= control target key start
LH: loop header
LB: loop body
LE: loop exit
PB: predicated region body
PF: predicated region fallthrough
CT: control target
= control target key end

     0   :  { %v231_v7 = vmov 0.0   ;;  %v140_v39 = vlaneseq  ;;  %s281_s0 = inlined_call_operand.vmem [shape: f32[16,8,128], index: 0, kind: input, shape index: {}]   ;;  %s282_s1 = inlined_call_operand.vmem [shape: f32[1,8,128], index: 1, kind: output, shape index: {}]  }
   0x1   :  { %v25_v0 = vld [vmem:[%s281_s0] sm:$0xff]  ;;  %v218_v1 = vld [vmem:[%s281_s0 + $0x8] sm:$0xff]  ;;  %v219_v2 = vld [vmem:[%s281_s0 + $0x10] sm:$0xff]  ;;  %181 = vst [vmem:[%s282_s1] sm:$0xff] %v231_v7 }
   0x2   :  { %v220_v3 = vld [vmem:[%s281_s0 + $0x18] sm:$0xff]  ;;  %v221_v4 = vld [vmem:[%s281_s0 + $0x20] sm:$0xff]  ;;  %v222_v5 = vld [vmem:[%s281_s0 + $0x28] sm:$0xff]  ;;  %v100_v6 = vadd.f32 %v219_v2, %v25_v0  ;;  %v141_v41 = vshrl.u32 %v140_v39, 7  ;;  %v143_v43 = vand.u32 127, %v140_v39 }
   0x3   :  { %v223_v8 = vld [vmem:[%s281_s0 + $0x30] sm:$0xff]  ;;  %v224_v9 = vld [vmem:[%s281_s0 + $0x38] sm:$0xff]  ;;  %v101_v10 = vadd.f32 %v220_v3, %v218_v1  ;;  %v106_v11 = vmin.f32 %v25_v0, %v221_v4  ;;  %v109_v12 = vmax.f32 %v25_v0, %v221_v4  ;;  %v113_v13 = vmin.f32 %v218_v1, %v222_v5  ;;  %v225_v22 = vld [vmem:[%s281_s0 + $0x40] sm:$0xff] }
   0x4   :  { %v103_v14 = vadd.f32 %v223_v8, %v221_v4  ;;  %v104_v15 = vadd.f32 %v224_v9, %v222_v5  ;;  %v107_v16 = vmin.f32 %v219_v2, %v223_v8  ;;  %v110_v17 = vmax.f32 %v219_v2, %v223_v8 }
   0x5   :  { %v102_v18 = vmul.f32 %v101_v10, %v100_v6  ;;  %v112_v19 = vmin.f32 %v220_v3, %v224_v9  ;;  %v115_v20 = vmax.f32 %v220_v3, %v224_v9  ;;  %v116_v21 = vmax.f32 %v218_v1, %v222_v5 }
   0x6   :  { %v105_v23 = vmul.f32 %v104_v15, %v103_v14  ;;  %v108_v24 = vadd.f32 %v107_v16, %v106_v11  ;;  %v111_v25 = vadd.f32 %v110_v17, %v109_v12  ;;  %v192_v28 = vrot.slane %v225_v22, 4 }
   0x7   :  { %v114_v26 = vadd.f32 %v113_v13, %v112_v19  ;;  %v117_v27 = vadd.f32 %v116_v21, %v115_v20  ;;  %v144_v44 = vmul.u32 128, %v141_v41 }
   0x8   :  { %v121_v29 = vadd.f32 %v105_v23, %v102_v18  ;;  %v193_v32 = vadd.f32 %v225_v22, %v192_v28 }
   0x9   :  { %v118_v30 = vmul.f32 %v117_v27, %v111_v25  ;;  %v120_v31 = vmul.f32 %v114_v26, %v108_v24  ;;  %v147_v49 = vadd.s32 %v144_v44, %v143_v43 }
   0xa   :  { %v194_v35 = vrot.slane %v193_v32, 2 }
   0xb   :  { %v119_v33 = vadd.f32 1e-07, %v118_v30  ;;  %v122_v34 = vsub.f32 %v121_v29, %v120_v31  ;;  %v123_v45 = vadd.f32 1.0, %v120_v31  ;;  %vm148_vm0 = vcmp.lt.s32.totalorder %v147_v49, 200 }
   0xc   :  { %v195_v37 = vadd.f32 %v194_v35, %v193_v32 }
   0xd   :  { %v124_v36 = vadd.f32 1.0, %v122_v34  ;;  %227 = vrcp.f32 %v119_v33  ;;  %v127_v42 = vsub.f32 %v119_v33, %v122_v34 }
   0xe   :  { %v196_v38 = vrot.slane %v195_v37, 1 }
   0xf   :  { %229 = vrcp.f32 %v124_v36 }
  0x10   :  { %v197_v40 = vadd.f32 %v196_v38, %v195_v37 }
  0x12   :  { %198 = vst [vmem:[%s282_s1 + $0x1] sm:$0x1] %v197_v40 }
  0x1a   :  { %v228_v46 = vpop.eup %227 }
  0x1b   :  { %v129_v47 = vmul.f32 %v228_v46, %v127_v42 }
  0x1c   :  { %v230_v48 = vpop.eup %229 }
  0x1d   :  { %v126_v50 = vmul.f32 %v230_v48, %v123_v45 }
  0x1f   :  { %v130_v51 = vsub.f32 %v126_v50, %v129_v47 }
  0x21   :  { %v131_v52 = vsub.f32 1.0, %v130_v51 }
  0x23   :  { %v149_v53 = vsel %vm148_vm0, %v131_v52, 0.0 }
  0x24   :  { %v151_v54 = vmul.f32 %v225_v22, %v149_v53  ;;  %v201_v55 = vrot.slane %v149_v53, 4 }
  0x26   :  { %v183_v56 = vrot.slane %v151_v54, 4  ;;  %v202_v57 = vadd.f32 %v201_v55, %v149_v53 }
  0x28   :  { %v184_v58 = vadd.f32 %v183_v56, %v151_v54  ;;  %v203_v59 = vrot.slane %v202_v57, 2 }
  0x2a   :  { %v185_v60 = vrot.slane %v184_v58, 2  ;;  %v204_v61 = vadd.f32 %v203_v59, %v202_v57 }
  0x2c   :  { %v186_v62 = vadd.f32 %v185_v60, %v184_v58  ;;  %v205_v63 = vrot.slane %v204_v61, 1 }
  0x2e   :  { %v187_v0 = vrot.slane %v186_v62, 1  ;;  %v206_v1 = vadd.f32 %v205_v63, %v204_v61 }
  0x30   :  { %v188_v2 = vadd.f32 %v187_v0, %v186_v62  ;;  %207 = vst [vmem:[%s282_s1 + $0x2] sm:$0x1] %v206_v1 }
  0x32   :  { %189 = vst [vmem:[%s282_s1] sm:$0x1] %v188_v2 }

</bundles_post_ra>
